<compile_context>
chip_gen: v6e
topology: v6e:2x2x1
jax: 0.10.0
libtpu: 0.0.40
codegen_flags: <defaults>
</compile_context>

<pallas_src>
import functools

import jax
import jax.numpy as jnp
from jax.experimental import pallas as pl
from jax.experimental.pallas import tpu as pltpu

LANES = 128
NEG_BIG = -1e30  # drives padded-action logits to ~-inf without inf arithmetic


def ppo_policy_kernel(x_ref, w1_ref, b1_ref, w2_ref, b2_ref, w3_ref, b3_ref,
                      probs_ref):
    # --- MLP hot path (MXU matmuls, f32 accumulation) ---
    x = x_ref[...]                                                    # (TB, D)
    h1 = jnp.dot(x, w1_ref[...], preferred_element_type=jnp.float32) + b1_ref[...]
    h1 = jnp.maximum(h1, 0.0)                                         # ReLU
    h2 = jnp.dot(h1, w2_ref[...], preferred_element_type=jnp.float32) + b2_ref[...]
    h2 = jnp.maximum(h2, 0.0)                                         # ReLU
    logits = jnp.dot(h2, w3_ref[...], preferred_element_type=jnp.float32) + b3_ref[...]

    # --- numerically-stable softmax over the (lane-padded) action dim ---
    # Padded lanes carry a ~-1e30 bias -> exp() == 0 exactly, so they add no
    # probability mass and the real actions' probabilities are unchanged.
    m = jnp.max(logits, axis=-1, keepdims=True)
    e = jnp.exp(logits - m)
    denom = jnp.sum(e, axis=-1, keepdims=True)
    probs_ref[...] = (e * pl.reciprocal(denom, approx=False)).astype(probs_ref.dtype)


@functools.partial(jax.jit, static_argnames=("tile_b",))
def ppo_policy_forward(x, params, *, tile_b=512):
    """Fused MLP + softmax. Returns categorical probabilities (B, a_dim)."""
    w1, b1, w2, b2, w3, b3 = params
    B, D = x.shape
    a_dim = w3.shape[1]

    # ---- lane-dense output: pad action dim up to a multiple of 128 ----
    a_pad = max(LANES, ((a_dim + LANES - 1) // LANES) * LANES)
    if a_pad != a_dim:
        w3 = jnp.pad(w3, ((0, 0), (0, a_pad - a_dim)))                   # zero weights
        b3 = jnp.pad(b3, ((0, 0), (0, a_pad - a_dim)),
                     constant_values=NEG_BIG)                            # -> prob 0
    # ---- batch tiling: pick a sublane-aligned tile, pad B to a multiple ----
    tb = min(tile_b, max(8, ((B + 7) // 8) * 8))
    tb = ((tb + 7) // 8) * 8
    B_pad = ((B + tb - 1) // tb) * tb
    if B_pad != B:
        x = jnp.pad(x, ((0, B_pad - B), (0, 0)))                         # junk rows, sliced off

    grid = (B_pad // tb,)
    full = lambda arr: pl.BlockSpec(arr.shape, lambda i: (0,) * arr.ndim)

    probs_pad = pl.pallas_call(
        ppo_policy_kernel,
        out_shape=jax.ShapeDtypeStruct((B_pad, a_pad), jnp.float32),
        grid=grid,
        in_specs=[
            pl.BlockSpec((tb, D), lambda i: (i, 0)),   # x streams per batch tile
            full(w1), full(b1), full(w2), full(b2), full(w3), full(b3),
        ],
        out_specs=pl.BlockSpec((tb, a_pad), lambda i: (i, 0)),
        compiler_params=pltpu.CompilerParams(
            dimension_semantics=("parallel",),          # v7x: shard batch over 2 TCs
        ),
    )(x, w1, b1, w2, b2, w3, b3)

    # Padded lanes hold exactly 0 probability, padded rows are garbage -> slice.
    return probs_pad[:B, :a_dim]


def init_params(key, input_dim, fc_dim, a_dim):
    """Deterministic synthetic parameters (nn.Linear weights, transposed)."""
    k1, k2, k3, k4, k5, k6 = jax.random.split(key, 6)
    scale = 0.1
    w1 = scale * jax.random.normal(k1, (input_dim, fc_dim), jnp.float32)
    b1 = scale * jax.random.normal(k2, (1, fc_dim), jnp.float32)
    w2 = scale * jax.random.normal(k3, (fc_dim, fc_dim), jnp.float32)
    b2 = scale * jax.random.normal(k4, (1, fc_dim), jnp.float32)
    w3 = scale * jax.random.normal(k5, (fc_dim, a_dim), jnp.float32)
    b3 = scale * jax.random.normal(k6, (1, a_dim), jnp.float32)
    return (w1, b1, w2, b2, w3, b3)


def reference_forward(x, params):
    """Pure-JAX reference for correctness checking."""
    w1, b1, w2, b2, w3, b3 = params
    h1 = jnp.maximum(x @ w1 + b1, 0.0)
    h2 = jnp.maximum(h1 @ w2 + b2, 0.0)
    logits = h2 @ w3 + b3
    return jax.nn.softmax(logits, axis=-1)


if __name__ == "__main__":
    key = jax.random.PRNGKey(0)
    kx, kp, kx2 = jax.random.split(key, 3)

    # Small shapes consistent with the module: batch=8, input_dim=32, fc_dim=32, a_dim=8
    B, input_dim, fc_dim, a_dim = 8, 32, 32, 8
    params = init_params(kp, input_dim, fc_dim, a_dim)

    # 1) tiny batch (the module's nominal use)
    x = jax.random.normal(kx, (B, input_dim), jnp.float32)
    probs = jax.block_until_ready(ppo_policy_forward(x, params))
    ref = reference_forward(x, params)
    assert probs.shape == (B, a_dim)
    assert jnp.allclose(jnp.sum(probs, axis=-1), 1.0, atol=1e-5)
    assert jnp.allclose(probs, ref, atol=1e-5, rtol=1e-5)

    # 2) larger rollout batch exercising the batch-tiled grid (non-multiple of tile)
    B2 = 1000
    x2 = jax.random.normal(kx2, (B2, input_dim), jnp.float32)
    probs2 = jax.block_until_ready(ppo_policy_forward(x2, params))
    ref2 = reference_forward(x2, params)
    assert probs2.shape == (B2, a_dim)
    assert jnp.allclose(jnp.sum(probs2, axis=-1), 1.0, atol=1e-5)
    assert jnp.allclose(probs2, ref2, atol=1e-5, rtol=1e-5)

    print("KERNEL_OK")
</pallas_src>

<mosaic_0001>
module attributes {stable_mosaic.version = 11 : i64} {
  func.func @ppo_policy_kernel(%arg0: i32, %arg1: memref<8x32xf32, #tpu.memory_space<vmem>>, %arg2: memref<32x32xf32, #tpu.memory_space<vmem>>, %arg3: memref<1x32xf32, #tpu.memory_space<vmem>>, %arg4: memref<32x32xf32, #tpu.memory_space<vmem>>, %arg5: memref<1x32xf32, #tpu.memory_space<vmem>>, %arg6: memref<32x128xf32, #tpu.memory_space<vmem>>, %arg7: memref<1x128xf32, #tpu.memory_space<vmem>>, %arg8: memref<8x128xf32, #tpu.memory_space<vmem>>) attributes {dimension_semantics = [#tpu.dimension_semantics<parallel>], iteration_bounds = array<i64: 1>, scalar_prefetch = 0 : i64, scratch_operands = 0 : i64, tpu.core_type = #tpu.core_type<tc>, window_params = [{transform_indices = @transform_0, window_bounds = array<i64: 8, 32>}, {pipeline_mode = #tpu.pipeline_mode<synchronous>, transform_indices = @transform_1, window_bounds = array<i64: 32, 32>}, {pipeline_mode = #tpu.pipeline_mode<synchronous>, transform_indices = @transform_2, window_bounds = array<i64: 1, 32>}, {pipeline_mode = #tpu.pipeline_mode<synchronous>, transform_indices = @transform_3, window_bounds = array<i64: 32, 32>}, {pipeline_mode = #tpu.pipeline_mode<synchronous>, transform_indices = @transform_4, window_bounds = array<i64: 1, 32>}, {pipeline_mode = #tpu.pipeline_mode<synchronous>, transform_indices = @transform_5, window_bounds = array<i64: 32, 128>}, {pipeline_mode = #tpu.pipeline_mode<synchronous>, transform_indices = @transform_6, window_bounds = array<i64: 1, 128>}, {transform_indices = @transform_7, window_bounds = array<i64: 8, 128>}]} {
    %c0 = arith.constant 0 : index
    %c0_0 = arith.constant 0 : index
    %0 = vector.load %arg1[%c0, %c0_0] : memref<8x32xf32, #tpu.memory_space<vmem>>, vector<8x32xf32>
    %c0_1 = arith.constant 0 : index
    %c0_2 = arith.constant 0 : index
    %1 = vector.load %arg2[%c0_1, %c0_2] : memref<32x32xf32, #tpu.memory_space<vmem>>, vector<32x32xf32>
    %cst = arith.constant dense<0.000000e+00> : vector<8x32xf32>
    %2 = tpu.matmul %0, %1, %cst {dimension_numbers = #tpu.dot_dimension_numbers<[1], [0], [0], [1], [0, 0, 1, 1], [], []>} : vector<8x32xf32>, vector<32x32xf32>, vector<8x32xf32> -> vector<8x32xf32>
    %c0_3 = arith.constant 0 : index
    %c0_4 = arith.constant 0 : index
    %3 = vector.load %arg3[%c0_3, %c0_4] : memref<1x32xf32, #tpu.memory_space<vmem>>, vector<1x32xf32>
    %4 = vector.broadcast %3 : vector<1x32xf32> to vector<8x32xf32>
    %5 = arith.addf %2, %4 : vector<8x32xf32>
    %cst_5 = arith.constant 0.000000e+00 : f32
    %6 = vector.broadcast %cst_5 : f32 to vector<8x32xf32>
    %7 = arith.maximumf %5, %6 : vector<8x32xf32>
    %c0_6 = arith.constant 0 : index
    %c0_7 = arith.constant 0 : index
    %8 = vector.load %arg4[%c0_6, %c0_7] : memref<32x32xf32, #tpu.memory_space<vmem>>, vector<32x32xf32>
    %cst_8 = arith.constant dense<0.000000e+00> : vector<8x32xf32>
    %9 = tpu.matmul %7, %8, %cst_8 {dimension_numbers = #tpu.dot_dimension_numbers<[1], [0], [0], [1], [0, 0, 1, 1], [], []>} : vector<8x32xf32>, vector<32x32xf32>, vector<8x32xf32> -> vector<8x32xf32>
    %c0_9 = arith.constant 0 : index
    %c0_10 = arith.constant 0 : index
    %10 = vector.load %arg5[%c0_9, %c0_10] : memref<1x32xf32, #tpu.memory_space<vmem>>, vector<1x32xf32>
    %11 = vector.broadcast %10 : vector<1x32xf32> to vector<8x32xf32>
    %12 = arith.addf %9, %11 : vector<8x32xf32>
    %cst_11 = arith.constant 0.000000e+00 : f32
    %13 = vector.broadcast %cst_11 : f32 to vector<8x32xf32>
    %14 = arith.maximumf %12, %13 : vector<8x32xf32>
    %c0_12 = arith.constant 0 : index
    %c0_13 = arith.constant 0 : index
    %15 = vector.load %arg6[%c0_12, %c0_13] : memref<32x128xf32, #tpu.memory_space<vmem>>, vector<32x128xf32>
    %cst_14 = arith.constant dense<0.000000e+00> : vector<8x128xf32>
    %16 = tpu.matmul %14, %15, %cst_14 {dimension_numbers = #tpu.dot_dimension_numbers<[1], [0], [0], [1], [0, 0, 1, 1], [], []>} : vector<8x32xf32>, vector<32x128xf32>, vector<8x128xf32> -> vector<8x128xf32>
    %c0_15 = arith.constant 0 : index
    %c0_16 = arith.constant 0 : index
    %17 = vector.load %arg7[%c0_15, %c0_16] : memref<1x128xf32, #tpu.memory_space<vmem>>, vector<1x128xf32>
    %18 = vector.broadcast %17 : vector<1x128xf32> to vector<8x128xf32>
    %19 = arith.addf %16, %18 : vector<8x128xf32>
    %cst_17 = arith.constant dense<0xFF800000> : vector<8xf32>
    %20 = vector.multi_reduction <maximumf>, %19, %cst_17 [1] : vector<8x128xf32> to vector<8xf32>
    %21 = vector.shape_cast %20 : vector<8xf32> to vector<8x1xf32>
    %22 = vector.broadcast %21 : vector<8x1xf32> to vector<8x128xf32>
    %23 = arith.subf %19, %22 : vector<8x128xf32>
    %24 = math.exp %23 : vector<8x128xf32>
    %cst_18 = arith.constant dense<0.000000e+00> : vector<8xf32>
    %25 = vector.multi_reduction <add>, %24, %cst_18 [1] : vector<8x128xf32> to vector<8xf32>
    %26 = vector.shape_cast %25 : vector<8xf32> to vector<8x1xf32>
    %27 = tpu.reciprocal %26 : vector<8x1xf32> -> vector<8x1xf32>
    %28 = vector.broadcast %27 : vector<8x1xf32> to vector<8x128xf32>
    %29 = arith.mulf %24, %28 : vector<8x128xf32>
    %c0_19 = arith.constant 0 : index
    %c0_20 = arith.constant 0 : index
    %30 = vector.load %arg8[%c0_19, %c0_20] : memref<8x128xf32, #tpu.memory_space<vmem>>, vector<8x128xf32>
    tpu.vector_store %arg8[%c0_19, %c0_20], %29 {strides = array<i32>} : memref<8x128xf32, #tpu.memory_space<vmem>>, vector<8x128xf32>,
    return
  }
  func.func @transform_0(%arg0: i32) -> (i32, i32) {
    %c0_i32 = arith.constant 0 : i32
    %c0_i32_0 = arith.constant 0 : i32
    return %arg0, %c0_i32 : i32, i32
  }
  func.func @transform_1(%arg0: i32) -> (i32, i32) {
    %c0_i32 = arith.constant 0 : i32
    %c0_i32_0 = arith.constant 0 : i32
    %c0_i32_1 = arith.constant 0 : i32
    return %c0_i32, %c0_i32_0 : i32, i32
  }
  func.func @transform_2(%arg0: i32) -> (i32, i32) {
    %c0_i32 = arith.constant 0 : i32
    %c0_i32_0 = arith.constant 0 : i32
    %c0_i32_1 = arith.constant 0 : i32
    return %c0_i32, %c0_i32_0 : i32, i32
  }
  func.func @transform_3(%arg0: i32) -> (i32, i32) {
    %c0_i32 = arith.constant 0 : i32
    %c0_i32_0 = arith.constant 0 : i32
    %c0_i32_1 = arith.constant 0 : i32
    return %c0_i32, %c0_i32_0 : i32, i32
  }
  func.func @transform_4(%arg0: i32) -> (i32, i32) {
    %c0_i32 = arith.constant 0 : i32
    %c0_i32_0 = arith.constant 0 : i32
    %c0_i32_1 = arith.constant 0 : i32
    return %c0_i32, %c0_i32_0 : i32, i32
  }
  func.func @transform_5(%arg0: i32) -> (i32, i32) {
    %c0_i32 = arith.constant 0 : i32
    %c0_i32_0 = arith.constant 0 : i32
    %c0_i32_1 = arith.constant 0 : i32
    return %c0_i32, %c0_i32_0 : i32, i32
  }
  func.func @transform_6(%arg0: i32) -> (i32, i32) {
    %c0_i32 = arith.constant 0 : i32
    %c0_i32_0 = arith.constant 0 : i32
    %c0_i32_1 = arith.constant 0 : i32
    return %c0_i32, %c0_i32_0 : i32, i32
  }
  func.func @transform_7(%arg0: i32) -> (i32, i32) {
    %c0_i32 = arith.constant 0 : i32
    %c0_i32_0 = arith.constant 0 : i32
    return %arg0, %c0_i32 : i32, i32
  }
}

</mosaic_0001>

<bundles_post_ra>
// kernel: ppo_policy_forward.1
= control target key start
LH: loop header
LB: loop body
LE: loop exit
PB: predicated region body
PF: predicated region fallthrough
CT: control target
= control target key end

     0   :  { %v390_v1 = vmov 0.0   ;;  %vm391_vm0 = vmmov 0   ;;  %s490_s0 = inlined_call_operand.vmem [shape: f32[8,32], index: 0, kind: input, shape index: {}]   ;;  %s491_s1 = inlined_call_operand.vmem [shape: f32[32,32], index: 1, kind: input, shape index: {}]   ;;  %s492_s2 = inlined_call_operand.vmem [shape: f32[1,32], index: 2, kind: input, shape index: {}]   ;;  %s493_s3 = inlined_call_operand.vmem [shape: f32[32,32], index: 3, kind: input, shape index: {}]   ;;  %s494_s4 = inlined_call_operand.vmem [shape: f32[1,32], index: 4, kind: input, shape index: {}]   ;;  %s495_s5 = inlined_call_operand.vmem [shape: f32[32,128], index: 5, kind: input, shape index: {}]   ;;  %s496_s6 = inlined_call_operand.vmem [shape: f32[1,128], index: 6, kind: input, shape index: {}]   ;;  %s497_s7 = inlined_call_operand.hbm [shape: f32[8,128], index: 7, kind: output, shape index: {}]  }
   0x1   :  { %v31_v0 = vld [vmem:[%s491_s1 + $0x18] sm:$0xff]  ;;  %328 = vmatprep.subr.mxu0 %v390_v1  ;;  %v30_v2 = vld [vmem:[%s491_s1 + $0x10] sm:$0xff]  ;;  %336 = vmatprep.mubr.msk.f32.mxu0 %vm391_vm0, %v390_v1 }
   0x2   :  { %v117_v3 = vld [vmem:[%s493_s3 + $0x18] sm:$0xff]  ;;  %329 = vmatpush3.msra.mxu0 %v31_v0  ;;  %339 = vmatprep.subr.mxu1 %v390_v1 }
   0x3   :  { %12 = vsyncpa [#allocation3], 0  ;;  %330 = vmatprep.subr.mxu0 %v390_v1  ;;  %v29_v4 = vld [vmem:[%s491_s1 + $0x8] sm:$0xff]  ;;  %340 = vmatpush3.msra.mxu1 %v117_v3  ;;  %v28_v5 = vld [vmem:[%s491_s1] sm:$0xff]  ;;  %vm39_vm1 = vcmask 261120  }
   0x4   :  { %331 = vmatpush3.msra.mxu0 %v30_v2  ;;  %341 = vmatprep.subr.mxu1 %v390_v1  ;;  %v27_v6 = vld [vmem:[%s490_s0] sm:$0xff]  ;;  %v116_v7 = vld [vmem:[%s493_s3 + $0x10] sm:$0xff]  ;;  %v115_v8 = vld [vmem:[%s493_s3 + $0x8] sm:$0xff] }
   0x5   :  { %332 = vmatprep.subr.mxu0 %v390_v1  ;;  %347 = vmatprep.mubr.msk.f32.mxu1 %vm391_vm0, %v390_v1  ;;  %v114_v9 = vld [vmem:[%s493_s3] sm:$0xff]  ;;  %v202_v10 = vld [vmem:[%s495_s5 + $0x18] sm:$0xff]  ;;  %v201_v16 = vld [vmem:[%s495_s5 + $0x10] sm:$0xff] }
   0x6   :  { %333 = vmatpush3.msra.mxu0 %v29_v4  ;;  %342 = vmatpush3.msra.mxu1 %v116_v7  ;;  %v307_v11 = vld [vmem:[%s492_s2] ss:$0 sm:$0xff]  ;;  %v200_v17 = vld [vmem:[%s495_s5 + $0x8] sm:$0xff] }
   0x7   :  { %334 = vmatprep.subr.mxu0 %v390_v1  ;;  %343 = vmatprep.subr.mxu1 %v390_v1  ;;  %v199_v18 = vld [vmem:[%s495_s5] sm:$0xff] }
   0x8   :  { %335 = vmatpush3.msra.mxu0 %v28_v5  ;;  %344 = vmatpush3.msra.mxu1 %v115_v8  ;;  %v309_v19 = vld [vmem:[%s494_s4] ss:$0 sm:$0xff]  ;;  %s392_s4 = smov [#allocation2]  }
   0x9   :  { %337 = vmatmul.mubr.msk.f32.vlgmr.msra.gmra.mxu0 %vm39_vm1, %v27_v6  ;;  %350 = vmatprep.subr.mxu0 %v390_v1  ;;  %v311_v24 = vld [vmem:[%s496_s6] ss:$0 sm:$0xff]  ;;  %s299_s5 = sshll.u32 %s392_s4, 4  ;;  %s300_s5 = int_to_ptr.vmem [resolvable:$true] %s299_s5 }
   0xa   :  { %358 = vmatprep.mubr.msk.f32.mxu0 %vm391_vm0, %v390_v1  ;;  %345 = vmatprep.subr.mxu1 %v390_v1  ;;  %s368_s29 = scalar_lea.vmem %s300_s5, 128  ;;  %p373_p1 = scmp.lt.s32.totalorder %s300_s5, %s300_s5 }
   0xb   :  { %346 = vmatpush3.msra.mxu1 %v114_v9  ;;  %351 = vmatpush3.msra.mxu0 %v202_v10  ;;  %p369_p0 = scmp.ne.s32.totalorder %s300_s5, %s368_s29  ;;  %p374_p2 = scmp.lt.s32.totalorder %s368_s29, %s368_s29 }
   0xc   :  { %352 = vmatprep.subr.mxu0 %v390_v1 }
   0xd   :  { %353 = vmatpush3.msra.mxu0 %v201_v16  ;;  %p375_p3 = por %p374_p2, %p373_p1 }
   0xe   :  { %354 = vmatprep.subr.mxu0 %v390_v1 }
   0xf   :  { %355 = vmatpush3.msra.mxu0 %v200_v17  ;;  %p376_p4 = pnand %p375_p3, %p369_p0 }
  0x10   :  { %356 = vmatprep.subr.mxu0 %v390_v1 }
  0x11   :  { %357 = vmatpush3.msra.mxu0 %v199_v18 }
  0xc9   :  { %v109_v12 = vpop.f32.mrf.mxu0 }
  0xca   :  { %v110_v13 = vadd.f32 %v307_v11, %v109_v12 }
  0xcb   :  { %v338_v14 = vpop.f32.mrf.mxu0 }
  0xcc   :  { %v113_v15 = vmax.f32 %v110_v13, 0.0 }
  0xce   :  { %348 = vmatmul.mubr.msk.f32.vlgmr.msra.gmra.mxu1 %vm39_vm1, %v113_v15 }
 0x18e   :  { %v194_v20 = vpop.f32.mrf.mxu1 }
 0x18f   :  { %v195_v21 = vadd.f32 %v309_v19, %v194_v20 }
 0x190   :  { %v349_v22 = vpop.f32.mrf.mxu1 }
 0x191   :  { %v198_v23 = vmax.f32 %v195_v21, 0.0 }
 0x193   :  { %359 = vmatmul.mubr.msk.f32.vlgmr.msra.gmra.mxu0 %vm39_vm1, %v198_v23 }
 0x253   :  { %v279_v25 = vpop.f32.mrf.mxu0 }
 0x254   :  { %v280_v26 = vadd.f32 %v311_v24, %v279_v25 }
 0x255   :  { %v360_v27 = vpop.f32.mrf.mxu0 }
 0x256   :  { %283 = vmax.xlane.f32.xlu0 %v280_v26 }
 0x2df   :  { %v284_v28 = vpop.xlane.xlu0 %283 }
 0x2e0   :  { %v285_v29 = vsub.f32 %v280_v26, %v284_v28 }
 0x2e2   :  { %v286_v30 = vmul.f32 1.442695, %v285_v29 }
 0x2e4   :  { %364 = vpow2.f32 %v286_v30 }
 0x2f1   :  { %v365_v31 = vpop.eup %364 }
 0x2f2   :  { %288 = vadd.xlane.f32.xlu0 %v365_v31 }
 0x37b   :  { %v289_v32 = vpop.xlane.xlu0 %288 }
 0x37c   :  { %366 = vrcp.f32 %v289_v32 }
 0x389   :  { %v367_v33 = vpop.eup %366 }
 0x38a   :  { %v291_v34 = vmul.f32 %v367_v33, %v365_v31 }
 0x38c   :  { %292 = vst [vmem:[#allocation2] sm:$0xff] %v291_v34 }
 0x38d   :  { %379 = shalt.err (!%p376_p4)
}
 0x38e   :  { %302 = dma.vmem_to_hbm [thread:$0]  %s300_s5, 128, %s497_s7, [#allocation3]  }
 0x38f   :  { %388 = dma.done.wait [#allocation3], 128  }
 0x390   :  { %389 = vsyncadd [#allocation3], 4294967168 }
 0x391   :  { %306 = vsyncpa [#allocation3], 1 }

</bundles_post_ra>
